<compile_context>
chip_gen: v6e
topology: v6e:2x2x1
jax: 0.10.0
libtpu: 0.0.40
codegen_flags: <defaults>
</compile_context>

<pallas_src>
import functools
import math

import jax
import jax.numpy as jnp
from jax.experimental import pallas as pl
from jax.experimental.pallas import tpu as pltpu

_HALF_LOG_2PI = 0.5 * math.log(2.0 * math.pi)
_LOG_2 = math.log(2.0)
_HIDDEN = 64      # logical hidden width (torch hidden_sizes=[64, 64])
_H_PAD = 128      # lane-padded hidden width used inside the kernel
_TB_CAP = 2048    # batch-tile cap (double-buffered tiles + f32 scratch stay ~1-2 MiB)


def _round_up(x, m):
    return ((x + m - 1) // m) * m


def _softplus(z):
    # Numerically-stable softplus from Mosaic-supported primitives.
    return jnp.maximum(z, 0.0) + jnp.log(1.0 + jnp.exp(-jnp.abs(z)))


def _mlp_heads(obs_ref, w1_ref, b1_ref, w2_ref, b2_ref, wh_ref, bh_ref):
    """Shared trunk: two ReLU layers + packed [mu | log_std] head. Returns f32 (TB, 2A)."""
    x = obs_ref[...]                                                        # bf16 (TB, D)
    h = jnp.dot(x, w1_ref[...], preferred_element_type=jnp.float32) + b1_ref[...]
    h = jnp.maximum(h, 0.0)
    h = jnp.dot(h.astype(jnp.bfloat16), w2_ref[...],
                preferred_element_type=jnp.float32) + b2_ref[...]
    h = jnp.maximum(h, 0.0)                                                 # (TB, 128)
    heads = jnp.dot(h.astype(jnp.bfloat16), wh_ref[...],
                    preferred_element_type=jnp.float32) + bh_ref[...]       # (TB, 2A)
    return heads


def actor_sample_kernel(obs_ref, eps_ref, w1_ref, b1_ref, w2_ref, b2_ref,
                        wh_ref, bh_ref, out_ref, *, action_dim,
                        log_std_min, log_std_max, action_scale):
    A = action_dim
    heads = _mlp_heads(obs_ref, w1_ref, b1_ref, w2_ref, b2_ref, wh_ref, bh_ref)
    mu = heads[:, :A]
    log_std = heads[:, A:]                                                  # unclamped (info)

    # ---- reparameterized sample + tanh squash + log-prob (VPU/EUP) ----
    log_std_c = jnp.clip(log_std, log_std_min, log_std_max)
    std = jnp.exp(log_std_c)
    eps = eps_ref[...]
    u = mu + std * eps                                                      # pre-tanh action

    # Normal(mu, std).log_prob(u) summed over action dims; (u - mu)/std == eps exactly.
    logp = jnp.sum(-0.5 * eps * eps - log_std_c - _HALF_LOG_2PI,
                   axis=-1, keepdims=True)
    # log_prob -= sum(2*(log 2 - u - softplus(-2u)))
    logp = logp - jnp.sum(2.0 * (_LOG_2 - u - _softplus(-2.0 * u)),
                          axis=-1, keepdims=True)

    # Single packed output slab [action | mu | log_std | logp] -> ONE output DMA stream.
    out_ref[:, :A] = jnp.tanh(u) * action_scale
    out_ref[:, A:2 * A] = mu
    out_ref[:, 2 * A:3 * A] = log_std
    out_ref[:, 3 * A:3 * A + 1] = logp


def actor_det_kernel(obs_ref, w1_ref, b1_ref, w2_ref, b2_ref, wh_ref, bh_ref,
                     out_ref):
    # Deterministic fast path: packed [mu | log_std] only, no sampling math, no extra stores.
    out_ref[...] = _mlp_heads(obs_ref, w1_ref, b1_ref, w2_ref, b2_ref, wh_ref, bh_ref)


def init_params(key, obs_dim, action_dim, hidden_sizes=(64, 64)):
    """torch.nn.Linear default init, weights stored (in, out), biases (out,)."""
    assert tuple(hidden_sizes) == (_HIDDEN, _HIDDEN)
    dims = [obs_dim] + list(hidden_sizes)
    params = []
    for d_in, d_out in zip(dims[:-1], dims[1:]):          # shared layers
        key, kw, kb = jax.random.split(key, 3)
        k = 1.0 / math.sqrt(d_in)
        params.append((jax.random.uniform(kw, (d_in, d_out), jnp.float32, -k, k),
                       jax.random.uniform(kb, (d_out,), jnp.float32, -k, k)))
    for _ in range(2):                                     # mu_FC, log_std_FC
        key, kw, kb = jax.random.split(key, 3)
        k = 1.0 / math.sqrt(dims[-1])
        params.append((jax.random.uniform(kw, (dims[-1], action_dim), jnp.float32, -k, k),
                       jax.random.uniform(kb, (action_dim,), jnp.float32, -k, k)))
    return params


def pack_params_for_kernel(params, obs_dim, action_dim):
    """Zero-pad hidden width to 128 lanes, pack mu/log_std heads, cast W to bf16."""
    (w1, b1), (w2, b2), (wmu, bmu), (wls, bls) = params
    Hn, Hp, A = _HIDDEN, _H_PAD, action_dim
    w1p = jnp.zeros((obs_dim, Hp), jnp.float32).at[:, :Hn].set(w1)
    b1p = jnp.zeros((1, Hp), jnp.float32).at[0, :Hn].set(b1)
    w2p = jnp.zeros((Hp, Hp), jnp.float32).at[:Hn, :Hn].set(w2)
    b2p = jnp.zeros((1, Hp), jnp.float32).at[0, :Hn].set(b2)
    whp = (jnp.zeros((Hp, 2 * A), jnp.float32)
           .at[:Hn, :A].set(wmu).at[:Hn, A:].set(wls))
    bhp = jnp.concatenate([bmu, bls]).reshape(1, 2 * A)
    return (w1p.astype(jnp.bfloat16), b1p,
            w2p.astype(jnp.bfloat16), b2p,
            whp.astype(jnp.bfloat16), bhp)


def _tiling(B):
    """>=2 grid steps whenever possible (v7x dual-TC), minimal batch padding (<8 rows/step)."""
    B8 = _round_up(B, 8)
    n_steps = max(pl.cdiv(B8, _TB_CAP), 2 if B8 >= 16 else 1)
    TB = _round_up(pl.cdiv(B8, n_steps), 8)
    return n_steps, TB, n_steps * TB


def squashed_gaussian_actor_forward(obs, kernel_params, *, action_dim, eps=None,
                                    log_std_min=-20.0, log_std_max=2.0,
                                    action_scale=1.0, deterministic=False):
    A = action_dim
    obs = obs.astype(jnp.bfloat16)       # kernel consumes bf16 MXU inputs; halves obs DMA
    B, D = obs.shape
    w1p, b1p, w2p, b2p, whp, bhp = kernel_params

    n_steps, TB, Bp = _tiling(B)
    if Bp != B:
        obs = jnp.pad(obs, ((0, Bp - B), (0, 0)))
    grid = (n_steps,)
    row = lambda i: (i, 0)               # batch-streamed operands
    rep = lambda i: (0, 0)               # VMEM-resident operands (weights/biases)

    weight_specs = [pl.BlockSpec((D, _H_PAD), rep),        # W1 (bf16)
                    pl.BlockSpec((1, _H_PAD), rep),        # b1
                    pl.BlockSpec((_H_PAD, _H_PAD), rep),   # W2 (bf16)
                    pl.BlockSpec((1, _H_PAD), rep),        # b2
                    pl.BlockSpec((_H_PAD, 2 * A), rep),    # packed head W (bf16)
                    pl.BlockSpec((1, 2 * A), rep)]         # packed head b
    weights = (w1p, b1p, w2p, b2p, whp, bhp)
    cparams = pltpu.CompilerParams(dimension_semantics=("parallel",))  # 2x on v7x dual-TC

    mm_flops = 2 * Bp * (D * _H_PAD + _H_PAD * _H_PAD + _H_PAD * 2 * A)
    w_bytes = (D * _H_PAD + _H_PAD * _H_PAD + _H_PAD * 2 * A) * 2 + (4 * _H_PAD + 8 * A)

    if deterministic:
        heads = pl.pallas_call(
            actor_det_kernel,
            out_shape=jax.ShapeDtypeStruct((Bp, 2 * A), jnp.float32),
            grid=grid,
            in_specs=[pl.BlockSpec((TB, D), row)] + weight_specs,
            out_specs=pl.BlockSpec((TB, 2 * A), row),
            compiler_params=cparams,
            cost_estimate=pl.CostEstimate(
                flops=mm_flops, transcendentals=0,
                bytes_accessed=Bp * D * 2 + w_bytes + Bp * 2 * A * 4),
        )(obs, *weights)
        mu = heads[:B, :A]
        log_std = heads[:B, A:]
        return mu, None, {'mu': mu, 'log_std': log_std}

    assert eps is not None, "stochastic path needs pre-sampled standard-normal eps"
    eps = eps.astype(jnp.float32)
    if Bp != B:
        eps = jnp.pad(eps, ((0, Bp - B), (0, 0)))

    kernel = functools.partial(actor_sample_kernel, action_dim=A,
                               log_std_min=float(log_std_min),
                               log_std_max=float(log_std_max),
                               action_scale=float(action_scale))
    out = pl.pallas_call(
        kernel,
        out_shape=jax.ShapeDtypeStruct((Bp, 3 * A + 1), jnp.float32),
        grid=grid,
        in_specs=[pl.BlockSpec((TB, D), row),              # obs (bf16)
                  pl.BlockSpec((TB, A), row)] + weight_specs,   # eps (f32)
        out_specs=pl.BlockSpec((TB, 3 * A + 1), row),      # [action | mu | log_std | logp]
        compiler_params=cparams,
        cost_estimate=pl.CostEstimate(
            flops=mm_flops, transcendentals=4 * Bp * A,
            bytes_accessed=Bp * D * 2 + Bp * A * 4 + w_bytes + Bp * (3 * A + 1) * 4),
    )(obs, eps, *weights)

    action = out[:B, :A]
    mu = out[:B, A:2 * A]
    log_std = out[:B, 2 * A:3 * A]
    log_prob = out[:B, 3 * A]
    return action, log_prob, {'mu': mu, 'log_std': log_std}


def reference_forward(obs, eps, params, *, log_std_min=-20.0, log_std_max=2.0,
                      action_scale=1.0):
    """Pure-JAX reference with the same bf16-matmul / f32-accumulate numerics."""
    (w1, b1), (w2, b2), (wmu, bmu), (wls, bls) = params
    bf = jnp.bfloat16
    dot = lambda a, b: jnp.dot(a.astype(bf), b.astype(bf),
                               preferred_element_type=jnp.float32)
    h = jnp.maximum(dot(obs, w1) + b1, 0.0)
    h = jnp.maximum(dot(h, w2) + b2, 0.0)
    mu = dot(h, wmu) + bmu
    log_std = dot(h, wls) + bls
    log_std_c = jnp.clip(log_std, log_std_min, log_std_max)
    std = jnp.exp(log_std_c)
    u = mu + std * eps
    logp = jnp.sum(-0.5 * eps * eps - log_std_c - _HALF_LOG_2PI, axis=-1)
    logp = logp - jnp.sum(2.0 * (_LOG_2 - u - _softplus(-2.0 * u)), axis=-1)
    action = jnp.tanh(u) * action_scale
    return action, logp, mu, log_std


if __name__ == "__main__":
    key = jax.random.PRNGKey(0)
    k_obs, k_eps, k_par = jax.random.split(key, 3)

    B, obs_dim, action_dim = 8, 12, 4
    obs = jax.random.normal(k_obs, (B, obs_dim), jnp.float32)
    eps = jax.random.normal(k_eps, (B, action_dim), jnp.float32)   # explicit rsample noise

    params = init_params(k_par, obs_dim, action_dim, hidden_sizes=(_HIDDEN, _HIDDEN))
    kernel_params = pack_params_for_kernel(params, obs_dim, action_dim)

    # ---- stochastic path ----
    action, log_prob, info = squashed_gaussian_actor_forward(
        obs, kernel_params, action_dim=action_dim, eps=eps)
    jax.block_until_ready((action, log_prob, info['mu'], info['log_std']))

    a_ref, lp_ref, mu_ref, ls_ref = reference_forward(obs, eps, params)

    assert action.shape == (B, action_dim)
    assert log_prob.shape == (B,)
    assert info['mu'].shape == (B, action_dim)
    assert info['log_std'].shape == (B, action_dim)
    assert jnp.allclose(action, a_ref, atol=1e-3, rtol=1e-3)
    assert jnp.allclose(log_prob, lp_ref, atol=1e-3, rtol=1e-3)
    assert jnp.allclose(info['mu'], mu_ref, atol=1e-3, rtol=1e-3)
    assert jnp.allclose(info['log_std'], ls_ref, atol=1e-3, rtol=1e-3)

    # ---- deterministic fast path: (mu, None, info), no eps needed ----
    mu_det, none_out, det_info = squashed_gaussian_actor_forward(
        obs, kernel_params, action_dim=action_dim, deterministic=True)
    jax.block_until_ready((mu_det, det_info['mu'], det_info['log_std']))
    assert none_out is None
    assert jnp.allclose(mu_det, mu_ref, atol=1e-3, rtol=1e-3)
    assert jnp.allclose(det_info['log_std'], ls_ref, atol=1e-3, rtol=1e-3)

    print("KERNEL_OK")
</pallas_src>

<mosaic_0001>
module attributes {stable_mosaic.version = 11 : i64} {
  func.func @actor_sample_kernel(%arg0: i32, %arg1: memref<8x12xbf16, #tpu.memory_space<vmem>>, %arg2: memref<8x4xf32, #tpu.memory_space<vmem>>, %arg3: memref<12x128xbf16, #tpu.memory_space<vmem>>, %arg4: memref<1x128xf32, #tpu.memory_space<vmem>>, %arg5: memref<128x128xbf16, #tpu.memory_space<vmem>>, %arg6: memref<1x128xf32, #tpu.memory_space<vmem>>, %arg7: memref<128x8xbf16, #tpu.memory_space<vmem>>, %arg8: memref<1x8xf32, #tpu.memory_space<vmem>>, %arg9: memref<8x13xf32, #tpu.memory_space<vmem>>) attributes {dimension_semantics = [#tpu.dimension_semantics<parallel>], iteration_bounds = array<i64: 1>, scalar_prefetch = 0 : i64, scratch_operands = 0 : i64, tpu.core_type = #tpu.core_type<tc>, window_params = [{transform_indices = @transform_0, window_bounds = array<i64: 8, 12>}, {transform_indices = @transform_1, window_bounds = array<i64: 8, 4>}, {pipeline_mode = #tpu.pipeline_mode<synchronous>, transform_indices = @transform_2, window_bounds = array<i64: 12, 128>}, {pipeline_mode = #tpu.pipeline_mode<synchronous>, transform_indices = @transform_3, window_bounds = array<i64: 1, 128>}, {pipeline_mode = #tpu.pipeline_mode<synchronous>, transform_indices = @transform_4, window_bounds = array<i64: 128, 128>}, {pipeline_mode = #tpu.pipeline_mode<synchronous>, transform_indices = @transform_5, window_bounds = array<i64: 1, 128>}, {pipeline_mode = #tpu.pipeline_mode<synchronous>, transform_indices = @transform_6, window_bounds = array<i64: 128, 8>}, {pipeline_mode = #tpu.pipeline_mode<synchronous>, transform_indices = @transform_7, window_bounds = array<i64: 1, 8>}, {transform_indices = @transform_8, window_bounds = array<i64: 8, 13>}]} {
    %c0 = arith.constant 0 : index
    %c0_0 = arith.constant 0 : index
    %0 = vector.load %arg1[%c0, %c0_0] : memref<8x12xbf16, #tpu.memory_space<vmem>>, vector<8x12xbf16>
    %c0_1 = arith.constant 0 : index
    %c0_2 = arith.constant 0 : index
    %1 = vector.load %arg3[%c0_1, %c0_2] : memref<12x128xbf16, #tpu.memory_space<vmem>>, vector<12x128xbf16>
    %cst = arith.constant dense<0.000000e+00> : vector<8x128xf32>
    %2 = tpu.matmul %0, %1, %cst {dimension_numbers = #tpu.dot_dimension_numbers<[1], [0], [0], [1], [0, 0, 1, 1], [], []>} : vector<8x12xbf16>, vector<12x128xbf16>, vector<8x128xf32> -> vector<8x128xf32>
    %c0_3 = arith.constant 0 : index
    %c0_4 = arith.constant 0 : index
    %3 = vector.load %arg4[%c0_3, %c0_4] : memref<1x128xf32, #tpu.memory_space<vmem>>, vector<1x128xf32>
    %4 = vector.broadcast %3 : vector<1x128xf32> to vector<8x128xf32>
    %5 = arith.addf %2, %4 : vector<8x128xf32>
    %cst_5 = arith.constant 0.000000e+00 : f32
    %6 = vector.broadcast %cst_5 : f32 to vector<8x128xf32>
    %7 = arith.maximumf %5, %6 : vector<8x128xf32>
    %8 = arith.truncf %7 : vector<8x128xf32> to vector<8x128xbf16>
    %c0_6 = arith.constant 0 : index
    %c0_7 = arith.constant 0 : index
    %9 = vector.load %arg5[%c0_6, %c0_7] : memref<128x128xbf16, #tpu.memory_space<vmem>>, vector<128x128xbf16>
    %cst_8 = arith.constant dense<0.000000e+00> : vector<8x128xf32>
    %10 = tpu.matmul %8, %9, %cst_8 {dimension_numbers = #tpu.dot_dimension_numbers<[1], [0], [0], [1], [0, 0, 1, 1], [], []>} : vector<8x128xbf16>, vector<128x128xbf16>, vector<8x128xf32> -> vector<8x128xf32>
    %c0_9 = arith.constant 0 : index
    %c0_10 = arith.constant 0 : index
    %11 = vector.load %arg6[%c0_9, %c0_10] : memref<1x128xf32, #tpu.memory_space<vmem>>, vector<1x128xf32>
    %12 = vector.broadcast %11 : vector<1x128xf32> to vector<8x128xf32>
    %13 = arith.addf %10, %12 : vector<8x128xf32>
    %cst_11 = arith.constant 0.000000e+00 : f32
    %14 = vector.broadcast %cst_11 : f32 to vector<8x128xf32>
    %15 = arith.maximumf %13, %14 : vector<8x128xf32>
    %16 = arith.truncf %15 : vector<8x128xf32> to vector<8x128xbf16>
    %c0_12 = arith.constant 0 : index
    %c0_13 = arith.constant 0 : index
    %17 = vector.load %arg7[%c0_12, %c0_13] : memref<128x8xbf16, #tpu.memory_space<vmem>>, vector<128x8xbf16>
    %cst_14 = arith.constant dense<0.000000e+00> : vector<8x8xf32>
    %18 = tpu.matmul %16, %17, %cst_14 {dimension_numbers = #tpu.dot_dimension_numbers<[1], [0], [0], [1], [0, 0, 1, 1], [], []>} : vector<8x128xbf16>, vector<128x8xbf16>, vector<8x8xf32> -> vector<8x8xf32>
    %c0_15 = arith.constant 0 : index
    %c0_16 = arith.constant 0 : index
    %19 = vector.load %arg8[%c0_15, %c0_16] : memref<1x8xf32, #tpu.memory_space<vmem>>, vector<1x8xf32>
    %20 = vector.broadcast %19 : vector<1x8xf32> to vector<8x8xf32>
    %21 = arith.addf %18, %20 : vector<8x8xf32>
    %22 = vector.extract_strided_slice %21 {offsets = [0, 0], sizes = [8, 4], strides = [1, 1]} : vector<8x8xf32> to vector<8x4xf32>
    %23 = vector.extract_strided_slice %21 {offsets = [0, 4], sizes = [8, 4], strides = [1, 1]} : vector<8x8xf32> to vector<8x4xf32>
    %cst_17 = arith.constant -2.000000e+01 : f32
    %cst_18 = arith.constant 2.000000e+00 : f32
    %24 = vector.broadcast %cst_17 : f32 to vector<8x4xf32>
    %25 = arith.maximumf %24, %23 : vector<8x4xf32>
    %26 = vector.broadcast %cst_18 : f32 to vector<8x4xf32>
    %27 = arith.minimumf %26, %25 : vector<8x4xf32>
    %28 = math.exp %27 : vector<8x4xf32>
    %c0_19 = arith.constant 0 : index
    %c0_20 = arith.constant 0 : index
    %29 = vector.load %arg2[%c0_19, %c0_20] : memref<8x4xf32, #tpu.memory_space<vmem>>, vector<8x4xf32>
    %30 = arith.mulf %28, %29 : vector<8x4xf32>
    %31 = arith.addf %22, %30 : vector<8x4xf32>
    %cst_21 = arith.constant -5.000000e-01 : f32
    %32 = vector.broadcast %cst_21 : f32 to vector<8x4xf32>
    %33 = arith.mulf %32, %29 : vector<8x4xf32>
    %34 = arith.mulf %33, %29 : vector<8x4xf32>
    %35 = arith.subf %34, %27 : vector<8x4xf32>
    %cst_22 = arith.constant 0.918938517 : f32
    %36 = vector.broadcast %cst_22 : f32 to vector<8x4xf32>
    %37 = arith.subf %35, %36 : vector<8x4xf32>
    %cst_23 = arith.constant dense<0.000000e+00> : vector<8xf32>
    %38 = vector.multi_reduction <add>, %37, %cst_23 [1] : vector<8x4xf32> to vector<8xf32>
    %39 = vector.shape_cast %38 : vector<8xf32> to vector<8x1xf32>
    %cst_24 = arith.constant 0.693147182 : f32
    %40 = vector.broadcast %cst_24 : f32 to vector<8x4xf32>
    %41 = arith.subf %40, %31 : vector<8x4xf32>
    %cst_25 = arith.constant -2.000000e+00 : f32
    %42 = vector.broadcast %cst_25 : f32 to vector<8x4xf32>
    %43 = arith.mulf %42, %31 : vector<8x4xf32>
    %cst_26 = arith.constant 0.000000e+00 : f32
    %44 = vector.broadcast %cst_26 : f32 to vector<8x4xf32>
    %45 = arith.maximumf %43, %44 : vector<8x4xf32>
    %46 = math.absf %43 : vector<8x4xf32>
    %cst_27 = arith.constant 0.000000e+00 : f32
    %47 = vector.broadcast %cst_27 : f32 to vector<8x4xf32>
    %48 = arith.subf %47, %46 : vector<8x4xf32>
    %49 = math.exp %48 : vector<8x4xf32>
    %cst_28 = arith.constant 1.000000e+00 : f32
    %50 = vector.broadcast %cst_28 : f32 to vector<8x4xf32>
    %51 = arith.addf %50, %49 : vector<8x4xf32>
    %52 = math.log %51 : vector<8x4xf32>
    %53 = arith.addf %45, %52 : vector<8x4xf32>
    %54 = arith.subf %41, %53 : vector<8x4xf32>
    %cst_29 = arith.constant 2.000000e+00 : f32
    %55 = vector.broadcast %cst_29 : f32 to vector<8x4xf32>
    %56 = arith.mulf %55, %54 : vector<8x4xf32>
    %cst_30 = arith.constant dense<0.000000e+00> : vector<8xf32>
    %57 = vector.multi_reduction <add>, %56, %cst_30 [1] : vector<8x4xf32> to vector<8xf32>
    %58 = vector.shape_cast %57 : vector<8xf32> to vector<8x1xf32>
    %59 = arith.subf %39, %58 : vector<8x1xf32>
    %60 = math.tanh %31 : vector<8x4xf32>
    %cst_31 = arith.constant 1.000000e+00 : f32
    %61 = vector.broadcast %cst_31 : f32 to vector<8x4xf32>
    %62 = arith.mulf %60, %61 : vector<8x4xf32>
    %c0_32 = arith.constant 0 : index
    %c0_33 = arith.constant 0 : index
    %63 = vector.load %arg9[%c0_32, %c0_33] : memref<8x13xf32, #tpu.memory_space<vmem>>, vector<8x4xf32>
    tpu.vector_store %arg9[%c0_32, %c0_33], %62 {strides = array<i32>} : memref<8x13xf32, #tpu.memory_space<vmem>>, vector<8x4xf32>,
    %c0_34 = arith.constant 0 : index
    %c4 = arith.constant 4 : index
    %64 = vector.load %arg9[%c0_34, %c4] : memref<8x13xf32, #tpu.memory_space<vmem>>, vector<8x4xf32>
    tpu.vector_store %arg9[%c0_34, %c4], %22 {strides = array<i32>} : memref<8x13xf32, #tpu.memory_space<vmem>>, vector<8x4xf32>,
    %c0_35 = arith.constant 0 : index
    %c8 = arith.constant 8 : index
    %65 = vector.load %arg9[%c0_35, %c8] : memref<8x13xf32, #tpu.memory_space<vmem>>, vector<8x4xf32>
    tpu.vector_store %arg9[%c0_35, %c8], %23 {strides = array<i32>} : memref<8x13xf32, #tpu.memory_space<vmem>>, vector<8x4xf32>,
    %c0_36 = arith.constant 0 : index
    %c12 = arith.constant 12 : index
    %66 = vector.load %arg9[%c0_36, %c12] : memref<8x13xf32, #tpu.memory_space<vmem>>, vector<8x1xf32>
    tpu.vector_store %arg9[%c0_36, %c12], %59 {strides = array<i32>} : memref<8x13xf32, #tpu.memory_space<vmem>>, vector<8x1xf32>,
    return
  }
  func.func @transform_0(%arg0: i32) -> (i32, i32) {
    %c0_i32 = arith.constant 0 : i32
    %c0_i32_0 = arith.constant 0 : i32
    return %arg0, %c0_i32 : i32, i32
  }
  func.func @transform_1(%arg0: i32) -> (i32, i32) {
    %c0_i32 = arith.constant 0 : i32
    %c0_i32_0 = arith.constant 0 : i32
    return %arg0, %c0_i32 : i32, i32
  }
  func.func @transform_2(%arg0: i32) -> (i32, i32) {
    %c0_i32 = arith.constant 0 : i32
    %c0_i32_0 = arith.constant 0 : i32
    %c0_i32_1 = arith.constant 0 : i32
    return %c0_i32, %c0_i32_0 : i32, i32
  }
  func.func @transform_3(%arg0: i32) -> (i32, i32) {
    %c0_i32 = arith.constant 0 : i32
    %c0_i32_0 = arith.constant 0 : i32
    %c0_i32_1 = arith.constant 0 : i32
    return %c0_i32, %c0_i32_0 : i32, i32
  }
  func.func @transform_4(%arg0: i32) -> (i32, i32) {
    %c0_i32 = arith.constant 0 : i32
    %c0_i32_0 = arith.constant 0 : i32
    %c0_i32_1 = arith.constant 0 : i32
    return %c0_i32, %c0_i32_0 : i32, i32
  }
  func.func @transform_5(%arg0: i32) -> (i32, i32) {
    %c0_i32 = arith.constant 0 : i32
    %c0_i32_0 = arith.constant 0 : i32
    %c0_i32_1 = arith.constant 0 : i32
    return %c0_i32, %c0_i32_0 : i32, i32
  }
  func.func @transform_6(%arg0: i32) -> (i32, i32) {
    %c0_i32 = arith.constant 0 : i32
    %c0_i32_0 = arith.constant 0 : i32
    %c0_i32_1 = arith.constant 0 : i32
    return %c0_i32, %c0_i32_0 : i32, i32
  }
  func.func @transform_7(%arg0: i32) -> (i32, i32) {
    %c0_i32 = arith.constant 0 : i32
    %c0_i32_0 = arith.constant 0 : i32
    %c0_i32_1 = arith.constant 0 : i32
    return %c0_i32, %c0_i32_0 : i32, i32
  }
  func.func @transform_8(%arg0: i32) -> (i32, i32) {
    %c0_i32 = arith.constant 0 : i32
    %c0_i32_0 = arith.constant 0 : i32
    return %arg0, %c0_i32 : i32, i32
  }
}

</mosaic_0001>

<bundles_post_ra>
// kernel: tpu_custom_call.1
= control target key start
LH: loop header
LB: loop body
LE: loop exit
PB: predicated region body
PF: predicated region fallthrough
CT: control target
= control target key end

     0   :  { %vm50_vm0 = vcmask 1045504   ;;  %v530_v0 = vmov 0.0   ;;  %vm531_vm1 = vmmov 0   ;;  %vm46_vm2 = vcmask 97280   ;;  %s674_s0 = inlined_call_operand.vmem [shape: bf16[8,12], index: 0, kind: input, shape index: {}]   ;;  %s675_s1 = inlined_call_operand.vmem [shape: f32[8,4], index: 1, kind: input, shape index: {}]   ;;  %s676_s2 = inlined_call_operand.vmem [shape: bf16[12,128], index: 2, kind: input, shape index: {}]   ;;  %s677_s3 = inlined_call_operand.vmem [shape: f32[1,128], index: 3, kind: input, shape index: {}]   ;;  %s678_s4 = inlined_call_operand.vmem [shape: bf16[128,128], index: 4, kind: input, shape index: {}]   ;;  %s679_s5 = inlined_call_operand.vmem [shape: f32[1,128], index: 5, kind: input, shape index: {}]   ;;  %s680_s6 = inlined_call_operand.vmem [shape: bf16[128,8], index: 6, kind: input, shape index: {}]   ;;  %s681_s7 = inlined_call_operand.vmem [shape: f32[1,8], index: 7, kind: input, shape index: {}]   ;;  %s682_s8 = inlined_call_operand.hbm [shape: f32[8,13], index: 8, kind: output, shape index: {}]  }
   0x1   :  { %432 = vmatprep.subr.bf16.mxu0 %v530_v0  ;;  %v483_v1 = vld [vmem:[%s676_s2] sm:$0x3f]   ;;  %438 = vmatprep.subr.bf16.mxu1 %v530_v0  ;;  %v484_v3 = vld [vmem:[%s678_s4 + $0x38] sm:$0xff]   ;;  %v485_v5 = vld [vmem:[%s678_s4 + $0x30] sm:$0xff]  }
   0x2   :  { %434 = vmatprep.mubr.msk.bf16.mxu0 %vm531_vm1, %v530_v0  ;;  %v31_v2 = vld [vmem:[%s674_s0] sm:$0xf]  ;;  %454 = vmatprep.mubr.msk.bf16.mxu1 %vm531_vm1, %v530_v0  ;;  %v52_v4 = vsel %vm50_vm0, %v483_v1, 0  ;;  %v486_v6 = vld [vmem:[%s678_s4 + $0x28] sm:$0xff]  }
   0x3   :  { %433 = vmatpush3.bf16.msra.mxu0 %v52_v4  ;;  %439 = vmatpush3.bf16.msra.mxu1 %v484_v3  ;;  %v487_v7 = vld [vmem:[%s678_s4 + $0x20] sm:$0xff]  }
   0x4   :  { %440 = vmatprep.subr.bf16.mxu1 %v530_v0  ;;  %458 = vmatprep.subr.bf16.mxu0 %v530_v0 }
   0x6   :  { %435 = vmatmul.mubr.msk.bf16.vlgmr.msra.gmra.mxu0 %vm46_vm2, %v31_v2 }
   0x7   :  { %441 = vmatpush3.bf16.msra.mxu1 %v485_v5  ;;  %474 = vmatprep.mubr.msk.bf16.mxu0 %vm531_vm1, %v530_v0 }
   0x8   :  { %442 = vmatprep.subr.bf16.mxu1 %v530_v0 }
   0xb   :  { %443 = vmatpush3.bf16.msra.mxu1 %v486_v6 }
   0xc   :  { %444 = vmatprep.subr.bf16.mxu1 %v530_v0 }
   0xd   :  { %13 = vsyncpa [#allocation3], 0  ;;  %v488_v8 = vld [vmem:[%s678_s4 + $0x18] sm:$0xff]   ;;  %v489_v9 = vld [vmem:[%s678_s4 + $0x10] sm:$0xff]   ;;  %s532_s17 = smov 4   ;;  %vm343_vm3 = vcmask 31744  }
   0xe   :  { %v490_v10 = vld [vmem:[%s678_s4 + $0x8] sm:$0xff]   ;;  %v491_v11 = vld [vmem:[%s678_s4] sm:$0xff]   ;;  %v492_v12 = vld [vmem:[%s680_s6 + $0x38] sm:$0xff]   ;;  %vm370_vm4 = vcmask 64544   ;;  %vm372_vm5 = vcmask 97344   ;;  %vm374_vm6 = vcmask 105568  }
   0xf   :  { %445 = vmatpush3.bf16.msra.mxu1 %v487_v7  ;;  %459 = vmatpush3.bf16.msra.mxu0 %v492_v12  ;;  %v493_v13 = vld [vmem:[%s680_s6 + $0x30] sm:$0xff]   ;;  %v494_v14 = vld [vmem:[%s680_s6 + $0x28] sm:$0xff]   ;;  %v495_v15 = vld [vmem:[%s680_s6 + $0x20] sm:$0xff]  }
  0x10   :  { %446 = vmatprep.subr.bf16.mxu1 %v530_v0  ;;  %460 = vmatprep.subr.bf16.mxu0 %v530_v0  ;;  %v496_v16 = vld [vmem:[%s680_s6 + $0x18] sm:$0xff]   ;;  %v497_v17 = vld [vmem:[%s680_s6 + $0x10] sm:$0xff]   ;;  %v390_v18 = vld [vmem:[%s677_s3] ss:$0 sm:$0xff] }
  0x11   :  { %v498_v26 = vld [vmem:[%s680_s6 + $0x8] sm:$0xff]   ;;  %v499_v27 = vld [vmem:[%s680_s6] sm:$0xff]  }
  0x12   :  { %v324_v28 = vld [vmem:[%s675_s1] sm:$0xff]  ;;  %s533_s1 = smov 124  }
  0x13   :  { %447 = vmatpush3.bf16.msra.mxu1 %v488_v8  ;;  %461 = vmatpush3.bf16.msra.mxu0 %v493_v13  ;;  %v393_v29 = vld [vmem:[%s679_s5] ss:$0 sm:$0xff]  ;;  %v335_v49 = vmul.f32 -0.5, %v324_v28  ;;  %s534_s5 = smov [#allocation2]  }
  0x14   :  { %448 = vmatprep.subr.bf16.mxu1 %v530_v0  ;;  %462 = vmatprep.subr.bf16.mxu0 %v530_v0  ;;  %v402_v37 = vld [vmem:[%s681_s7] ss:$0 sm:$0xff]  ;;  %s382_s7 = sshll.u32 %s534_s5, 4  ;;  %s383_s7 = int_to_ptr.vmem [resolvable:$true] %s382_s7 }
  0x15   :  { %326 = vrot.lane.b32.xlu0 %v324_v28, %s532_s17  ;;  %v336_v50 = vmul.f32 %v335_v49, %v324_v28  ;;  %s508_s21 = scalar_lea.vmem %s383_s7, 128  ;;  %p513_p1 = scmp.lt.s32.totalorder %s383_s7, %s383_s7 }
  0x16   :  { %p509_p0 = scmp.ne.s32.totalorder %s383_s7, %s508_s21  ;;  %p514_p2 = scmp.lt.s32.totalorder %s508_s21, %s508_s21 }
  0x17   :  { %449 = vmatpush3.bf16.msra.mxu1 %v489_v9  ;;  %463 = vmatpush3.bf16.msra.mxu0 %v494_v14 }
  0x18   :  { %450 = vmatprep.subr.bf16.mxu1 %v530_v0  ;;  %464 = vmatprep.subr.bf16.mxu0 %v530_v0  ;;  %p515_p3 = por %p514_p2, %p513_p1 }
  0x1a   :  { %p516_p4 = pnand %p515_p3, %p509_p0 }
  0x1b   :  { %451 = vmatpush3.bf16.msra.mxu1 %v490_v10  ;;  %465 = vmatpush3.bf16.msra.mxu0 %v495_v15 }
  0x1c   :  { %452 = vmatprep.subr.bf16.mxu1 %v530_v0  ;;  %466 = vmatprep.subr.bf16.mxu0 %v530_v0 }
  0x1f   :  { %453 = vmatpush3.bf16.msra.mxu1 %v491_v11  ;;  %467 = vmatpush3.bf16.msra.mxu0 %v496_v16 }
  0x20   :  { %468 = vmatprep.subr.bf16.mxu0 %v530_v0 }
  0x23   :  { %469 = vmatpush3.bf16.msra.mxu0 %v497_v17 }
  0x24   :  { %470 = vmatprep.subr.bf16.mxu0 %v530_v0 }
  0x27   :  { %471 = vmatpush3.bf16.msra.mxu0 %v498_v26 }
  0x28   :  { %472 = vmatprep.subr.bf16.mxu0 %v530_v0 }
  0x2b   :  { %473 = vmatpush3.bf16.msra.mxu0 %v499_v27 }
  0x87   :  { %v327_v46 = vpop.permute.xlu0 %326 }
  0xc6   :  { %v88_v19 = vpop.f32.mrf.mxu0 }
  0xc7   :  { %v89_v20 = vadd.f32 %v390_v18, %v88_v19 }
  0xc8   :  { %v436_v21 = vpop.f32.mrf.mxu0 }
  0xc9   :  { %v94_v22 = vmax.f32 %v89_v20, 0.0 }
  0xca   :  { %v91_v23 = vpop.f32.mrf.mxu0 }
  0xcb   :  { %v95_v24 = vpack.c.bf16 %v94_v22, %v94_v22 }
  0xcc   :  { %v437_v25 = vpop.f32.mrf.mxu0 }
  0xcd   :  { %455 = vmatmul.mubr.bf16.vlgmr.msra.gmra.mxu1 %v95_v24 }
 0x18d   :  { %v201_v30 = vpop.f32.mrf.mxu1 }
 0x18e   :  { %v202_v31 = vadd.f32 %v393_v29, %v201_v30 }
 0x18f   :  { %v456_v32 = vpop.f32.mrf.mxu1 }
 0x190   :  { %v207_v33 = vmax.f32 %v202_v31, 0.0 }
 0x191   :  { %v204_v34 = vpop.f32.mrf.mxu1 }
 0x192   :  { %v208_v35 = vpack.c.bf16 %v207_v33, %v207_v33 }
 0x193   :  { %v457_v36 = vpop.f32.mrf.mxu1 }
 0x194   :  { %475 = vmatmul.mubr.bf16.vlgmr.msra.gmra.mxu0 %v208_v35 }
 0x254   :  { %v314_v38 = vpop.f32.mrf.mxu0 }
 0x255   :  { %v315_v39 = vadd.f32 %v402_v37, %v314_v38 }
 0x256   :  { %v476_v40 = vpop.f32.mrf.mxu0 }
 0x257   :  { %v320_v41 = vmax.f32 %v315_v39, -20.0 }
 0x258   :  { %v317_v42 = vpop.f32.mrf.mxu0 }
 0x259   :  { %v321_v43 = vmin.f32 %v320_v41, 2.0 }
 0x25a   :  { %v477_v44 = vpop.f32.mrf.mxu0 }
 0x25b   :  { %338 = vrot.lane.b32.xlu1 %v321_v43, %s533_s1  ;;  %v322_v45 = vmul.f32 1.442695, %v321_v43 }
 0x25d   :  { %500 = vpow2.f32 %v322_v45 }
 0x26a   :  { %v501_v47 = vpop.eup %500 }
 0x26b   :  { %v329_v48 = vmul.f32 %v501_v47, %v327_v46 }
 0x26d   :  { %331 = vrot.lane.b32.xlu0 %v329_v48, %s533_s1 }
 0x2cd   :  { %v339_v51 = vpop.permute.xlu1 %338 }
 0x2ce   :  { %v341_v52 = vsub.f32 %v336_v50, %v339_v51 }
 0x2d0   :  { %v411_v53 = vadd.f32 -0.9189385, %v341_v52 }
 0x2d2   :  { %v344_v54 = vsel %vm343_vm3, %v411_v53, 0.0 }
 0x2d3   :  { %345 = vadd.xlane.f32.xlu1 %v344_v54 }
 0x2df   :  { %v332_v55 = vpop.permute.xlu0 %331 }
 0x2e0   :  { %v334_v56 = vadd.f32 %v332_v55, %v315_v39 }
 0x2e2   :  { %v348_v57 = vmul.f32 -2.0, %v334_v56  ;;  %502 = vtanh.f32 %v334_v56  ;;  %v347_v3 = vsub.f32 0.6931472, %v334_v56 }
 0x2e4   :  { %v350_v58 = vand.u32 2147483647, %v348_v57  ;;  %v349_v1 = vmax.f32 %v348_v57, 0.0 }
 0x2e6   :  { %v351_v59 = vsub.f32 0.0, %v350_v58 }
 0x2e8   :  { %v352_v60 = vmul.f32 1.442695, %v351_v59 }
 0x2ea   :  { %504 = vpow2.f32 %v352_v60 }
 0x2ef   :  { %v503_v61 = vpop.eup %502 }
 0x2f0   :  { %365 = vst.msk [vmem:[#allocation2] sm:$0xff] %vm343_vm3, %v503_v61 }
 0x2f7   :  { %v505_v62 = vpop.eup %504 }
 0x2f8   :  { %v354_v63 = vadd.f32 1.0, %v505_v62 }
 0x2fa   :  { %506 = vlog2.f32 %v354_v63 }
 0x307   :  { %v507_v0 = vpop.eup %506 }
 0x308   :  { %v356_v2 = vmul.f32 0.6931472, %v507_v0 }
 0x30a   :  { %v357_v4 = vadd.f32 %v356_v2, %v349_v1 }
 0x30c   :  { %v358_v5 = vsub.f32 %v347_v3, %v357_v4 }
 0x30e   :  { %v359_v6 = vmul.f32 2.0, %v358_v5 }
 0x310   :  { %v360_v7 = vsel %vm343_vm3, %v359_v6, 0.0 }
 0x311   :  { %361 = vadd.xlane.f32.xlu0 %v360_v7 }
 0x327   :  { %367 = vrot.lane.b32.xlu0 %v315_v39, %s532_s17 }
 0x35c   :  { %v346_v9 = vpop.xlane.xlu1 %345 }
 0x39a   :  { %v362_v8 = vpop.xlane.xlu0 %361 }
 0x39b   :  { %v363_v11 = vsub.f32 %v346_v9, %v362_v8 }
 0x39e   :  { %v368_v10 = vpop.permute.xlu0 %367 }
 0x39f   :  { %371 = vst.msk [vmem:[#allocation2] sm:$0xff] %vm370_vm4, %v368_v10 }
 0x3a0   :  { %373 = vst.msk [vmem:[#allocation2] sm:$0xff] %vm372_vm5, %v368_v10 }
 0x3a1   :  { %375 = vst.msk [vmem:[#allocation2] sm:$0xff] %vm374_vm6, %v363_v11 }
 0x3a2   :  { %519 = shalt.err (!%p516_p4)
}
 0x3a3   :  { %385 = dma.vmem_to_hbm [thread:$0]  %s383_s7, 128, %s682_s8, [#allocation3]  }
 0x3a4   :  { %528 = dma.done.wait [#allocation3], 128  }
 0x3a5   :  { %529 = vsyncadd [#allocation3], 4294967168 }
 0x3a6   :  { %389 = vsyncpa [#allocation3], 1 }

</bundles_post_ra>
